<compile_context>
chip_gen: v5e
topology: v5e:2x2
jax: 0.10.0
libtpu: 0.0.40
codegen_flags: <defaults>
</compile_context>

<pallas_src>
import functools

import jax
import jax.numpy as jnp
from jax.experimental import pallas as pl
from jax.experimental.pallas import tpu as pltpu

H = 128  # hidden width fixed by the PyTorch module


def ae_kernel(x_ref,
              w1_ref, b1_ref,
              w2_ref, b2_ref,
              w3_ref, b3_ref,
              w4_ref, b4_ref,
              o_ref):
    def layer(h, w_ref, b_ref):
        # Feed the MXU in the weights' dtype (bf16 fast path on v6e/v7x),
        # accumulate in f32, then do bias + ReLU in f32 on the VPU.
        h = jnp.dot(h.astype(w_ref.dtype), w_ref[...],
                    preferred_element_type=jnp.float32)
        return jnp.maximum(h + b1_ref.dtype.type(0) + b_ref[...], 0.0) \
            if False else jnp.maximum(h + b_ref[...], 0.0)

    h = x_ref[...].astype(jnp.float32)
    h = layer(h, w1_ref, b1_ref)   # encoder hidden: D -> 128, ReLU
    h = layer(h, w2_ref, b2_ref)   # encoder output: 128 -> 128, ReLU
    h = layer(h, w3_ref, b3_ref)   # decoder hidden: 128 -> 128, ReLU
    h = layer(h, w4_ref, b4_ref)   # decoder output: 128 -> D, ReLU
    o_ref[...] = h.astype(o_ref.dtype)


def prepare_params(params, weight_dtype=jnp.bfloat16):
    """One-time (load-time) conversion of PyTorch-shaped params to kernel layout.

    PyTorch Linear stores weight as (out, in); the kernel wants (in, out).
    Doing the transpose + dtype cast here keeps it off the inference path.
    Biases stay f32 (added in the f32 epilogue).
    """
    d = params["enc_hid_w"].shape[1]

    def w(name):
        return jnp.asarray(params[name], jnp.float32).T.astype(weight_dtype)

    def b(name, n):
        return jnp.asarray(params[name], jnp.float32).reshape(1, n)

    return {
        "w1": w("enc_hid_w"), "b1": b("enc_hid_b", H),
        "w2": w("enc_out_w"), "b2": b("enc_out_b", H),
        "w3": w("dec_hid_w"), "b3": b("dec_hid_b", H),
        "w4": w("dec_out_w"), "b4": b("dec_out_b", d),
    }


def _pick_tile_b(batch, max_tile=256):
    """Largest batch tile <= max_tile; prefer one dividing B (no padded tiles)."""
    if batch <= max_tile:
        return batch
    for t in (256, 128, 64, 32, 16, 8):
        if t <= max_tile and batch % t == 0:
            return t
    return max_tile  # fall back: Pallas masks the partial last tile


@functools.partial(jax.jit, static_argnames=("tile_b", "max_tile_b"))
def ae_forward(x, kp, *, tile_b=None, max_tile_b=256):
    """x: (B, D) float32. kp: dict from prepare_params (kernel-layout params)."""
    B, D = x.shape
    if tile_b is None:
        # 256 rows fills the 256-wide MXU on v6e/v7x; use max_tile_b=128 on v5e.
        tile_b = _pick_tile_b(B, max_tile_b)

    grid = (pl.cdiv(B, tile_b),)

    # Weights/biases are grid-invariant (index_map constant across batch tiles).
    rep = lambda shape: pl.BlockSpec(shape, lambda i: (0, 0))

    weight_bytes = sum(int(a.size) * a.dtype.itemsize for a in kp.values())
    cost = pl.CostEstimate(
        flops=2 * B * (D * H + H * H + H * H + H * D),
        transcendentals=0,
        bytes_accessed=2 * int(x.size) * x.dtype.itemsize + weight_bytes,
    )

    return pl.pallas_call(
        ae_kernel,
        out_shape=jax.ShapeDtypeStruct((B, D), x.dtype),
        grid_spec=pltpu.PrefetchScalarGridSpec(
            num_scalar_prefetch=0,
            grid=grid,
            in_specs=[
                pl.BlockSpec((tile_b, D), lambda i: (i, 0)),  # x batch tile
                rep((D, H)), rep((1, H)),                     # encoder hidden
                rep((H, H)), rep((1, H)),                     # encoder output
                rep((H, H)), rep((1, H)),                     # decoder hidden
                rep((H, D)), rep((1, D)),                     # decoder output
            ],
            out_specs=pl.BlockSpec((tile_b, D), lambda i: (i, 0)),
        ),
        compiler_params=pltpu.CompilerParams(
            dimension_semantics=("parallel",)),  # batch tiles shard across TCs
        cost_estimate=cost,
    )(x, kp["w1"], kp["b1"], kp["w2"], kp["b2"],
      kp["w3"], kp["b3"], kp["w4"], kp["b4"])


def init_params(key, input_shape):
    """Deterministic synthetic init matching the PyTorch module's shapes."""
    ks = jax.random.split(key, 8)

    def lin(kw, kb, out_f, in_f):
        # PyTorch Linear stores weight as (out_features, in_features)
        bound = 1.0 / jnp.sqrt(in_f)
        w = jax.random.uniform(kw, (out_f, in_f), jnp.float32, -bound, bound)
        b = jax.random.uniform(kb, (out_f,), jnp.float32, -bound, bound)
        return w, b

    p = {}
    p["enc_hid_w"], p["enc_hid_b"] = lin(ks[0], ks[1], H, input_shape)
    p["enc_out_w"], p["enc_out_b"] = lin(ks[2], ks[3], H, H)
    p["dec_hid_w"], p["dec_hid_b"] = lin(ks[4], ks[5], H, H)
    p["dec_out_w"], p["dec_out_b"] = lin(ks[6], ks[7], input_shape, H)
    return p


def ae_reference(x, p):
    """Pure-JAX f32 reference mirroring the PyTorch forward."""
    h = jnp.maximum(x @ p["enc_hid_w"].T + p["enc_hid_b"], 0.0)
    h = jnp.maximum(h @ p["enc_out_w"].T + p["enc_out_b"], 0.0)
    h = jnp.maximum(h @ p["dec_hid_w"].T + p["dec_hid_b"], 0.0)
    h = jnp.maximum(h @ p["dec_out_w"].T + p["dec_out_b"], 0.0)
    return h


if __name__ == "__main__":
    key = jax.random.PRNGKey(0)
    k_x, k_p = jax.random.split(key)

    B = 8              # batch
    INPUT_SHAPE = 256  # kwargs['input_shape']

    x = jax.random.normal(k_x, (B, INPUT_SHAPE), jnp.float32)
    params = init_params(k_p, INPUT_SHAPE)
    ref = ae_reference(x, params)

    # 1) f32-weight path: bit-for-bit-ish exactness check vs. the reference.
    kp_f32 = prepare_params(params, weight_dtype=jnp.float32)
    out_f32 = jax.block_until_ready(ae_forward(x, kp_f32))
    assert out_f32.shape == (B, INPUT_SHAPE)
    assert jnp.allclose(out_f32, ref, atol=1e-4, rtol=1e-4)

    # 2) Default bf16-weight path (MXU fast path on v6e/v7x): looser tolerance.
    kp_bf16 = prepare_params(params)  # bfloat16 weights, f32 biases
    out_bf16 = jax.block_until_ready(ae_forward(x, kp_bf16))
    assert out_bf16.shape == (B, INPUT_SHAPE)
    assert jnp.allclose(out_bf16, ref, atol=5e-2, rtol=5e-2)

    print("KERNEL_OK")
</pallas_src>

<mosaic_0001>
module attributes {stable_mosaic.version = 11 : i64} {
  func.func @ae_kernel(%arg0: i32, %arg1: memref<8x256xf32, #tpu.memory_space<vmem>>, %arg2: memref<256x128xf32, #tpu.memory_space<vmem>>, %arg3: memref<1x128xf32, #tpu.memory_space<vmem>>, %arg4: memref<128x128xf32, #tpu.memory_space<vmem>>, %arg5: memref<1x128xf32, #tpu.memory_space<vmem>>, %arg6: memref<128x128xf32, #tpu.memory_space<vmem>>, %arg7: memref<1x128xf32, #tpu.memory_space<vmem>>, %arg8: memref<128x256xf32, #tpu.memory_space<vmem>>, %arg9: memref<1x256xf32, #tpu.memory_space<vmem>>, %arg10: memref<8x256xf32, #tpu.memory_space<vmem>>) attributes {dimension_semantics = [#tpu.dimension_semantics<parallel>], iteration_bounds = array<i64: 1>, scalar_prefetch = 0 : i64, scratch_operands = 0 : i64, tpu.core_type = #tpu.core_type<tc>, window_params = [{transform_indices = @transform_0, window_bounds = array<i64: 8, 256>}, {pipeline_mode = #tpu.pipeline_mode<synchronous>, transform_indices = @transform_1, window_bounds = array<i64: 256, 128>}, {pipeline_mode = #tpu.pipeline_mode<synchronous>, transform_indices = @transform_2, window_bounds = array<i64: 1, 128>}, {pipeline_mode = #tpu.pipeline_mode<synchronous>, transform_indices = @transform_3, window_bounds = array<i64: 128, 128>}, {pipeline_mode = #tpu.pipeline_mode<synchronous>, transform_indices = @transform_4, window_bounds = array<i64: 1, 128>}, {pipeline_mode = #tpu.pipeline_mode<synchronous>, transform_indices = @transform_5, window_bounds = array<i64: 128, 128>}, {pipeline_mode = #tpu.pipeline_mode<synchronous>, transform_indices = @transform_6, window_bounds = array<i64: 1, 128>}, {pipeline_mode = #tpu.pipeline_mode<synchronous>, transform_indices = @transform_7, window_bounds = array<i64: 128, 256>}, {pipeline_mode = #tpu.pipeline_mode<synchronous>, transform_indices = @transform_8, window_bounds = array<i64: 1, 256>}, {transform_indices = @transform_9, window_bounds = array<i64: 8, 256>}]} {
    %c0 = arith.constant 0 : index
    %c0_0 = arith.constant 0 : index
    %0 = vector.load %arg1[%c0, %c0_0] : memref<8x256xf32, #tpu.memory_space<vmem>>, vector<8x256xf32>
    %c0_1 = arith.constant 0 : index
    %c0_2 = arith.constant 0 : index
    %1 = vector.load %arg2[%c0_1, %c0_2] : memref<256x128xf32, #tpu.memory_space<vmem>>, vector<256x128xf32>
    %cst = arith.constant dense<0.000000e+00> : vector<8x128xf32>
    %2 = tpu.matmul %0, %1, %cst {dimension_numbers = #tpu.dot_dimension_numbers<[1], [0], [0], [1], [0, 0, 1, 1], [], []>} : vector<8x256xf32>, vector<256x128xf32>, vector<8x128xf32> -> vector<8x128xf32>
    %c0_3 = arith.constant 0 : index
    %c0_4 = arith.constant 0 : index
    %3 = vector.load %arg3[%c0_3, %c0_4] : memref<1x128xf32, #tpu.memory_space<vmem>>, vector<1x128xf32>
    %4 = vector.broadcast %3 : vector<1x128xf32> to vector<8x128xf32>
    %5 = arith.addf %2, %4 : vector<8x128xf32>
    %cst_5 = arith.constant 0.000000e+00 : f32
    %6 = vector.broadcast %cst_5 : f32 to vector<8x128xf32>
    %7 = arith.maximumf %5, %6 : vector<8x128xf32>
    %c0_6 = arith.constant 0 : index
    %c0_7 = arith.constant 0 : index
    %8 = vector.load %arg4[%c0_6, %c0_7] : memref<128x128xf32, #tpu.memory_space<vmem>>, vector<128x128xf32>
    %cst_8 = arith.constant dense<0.000000e+00> : vector<8x128xf32>
    %9 = tpu.matmul %7, %8, %cst_8 {dimension_numbers = #tpu.dot_dimension_numbers<[1], [0], [0], [1], [0, 0, 1, 1], [], []>} : vector<8x128xf32>, vector<128x128xf32>, vector<8x128xf32> -> vector<8x128xf32>
    %c0_9 = arith.constant 0 : index
    %c0_10 = arith.constant 0 : index
    %10 = vector.load %arg5[%c0_9, %c0_10] : memref<1x128xf32, #tpu.memory_space<vmem>>, vector<1x128xf32>
    %11 = vector.broadcast %10 : vector<1x128xf32> to vector<8x128xf32>
    %12 = arith.addf %9, %11 : vector<8x128xf32>
    %cst_11 = arith.constant 0.000000e+00 : f32
    %13 = vector.broadcast %cst_11 : f32 to vector<8x128xf32>
    %14 = arith.maximumf %12, %13 : vector<8x128xf32>
    %c0_12 = arith.constant 0 : index
    %c0_13 = arith.constant 0 : index
    %15 = vector.load %arg6[%c0_12, %c0_13] : memref<128x128xf32, #tpu.memory_space<vmem>>, vector<128x128xf32>
    %cst_14 = arith.constant dense<0.000000e+00> : vector<8x128xf32>
    %16 = tpu.matmul %14, %15, %cst_14 {dimension_numbers = #tpu.dot_dimension_numbers<[1], [0], [0], [1], [0, 0, 1, 1], [], []>} : vector<8x128xf32>, vector<128x128xf32>, vector<8x128xf32> -> vector<8x128xf32>
    %c0_15 = arith.constant 0 : index
    %c0_16 = arith.constant 0 : index
    %17 = vector.load %arg7[%c0_15, %c0_16] : memref<1x128xf32, #tpu.memory_space<vmem>>, vector<1x128xf32>
    %18 = vector.broadcast %17 : vector<1x128xf32> to vector<8x128xf32>
    %19 = arith.addf %16, %18 : vector<8x128xf32>
    %cst_17 = arith.constant 0.000000e+00 : f32
    %20 = vector.broadcast %cst_17 : f32 to vector<8x128xf32>
    %21 = arith.maximumf %19, %20 : vector<8x128xf32>
    %c0_18 = arith.constant 0 : index
    %c0_19 = arith.constant 0 : index
    %22 = vector.load %arg8[%c0_18, %c0_19] : memref<128x256xf32, #tpu.memory_space<vmem>>, vector<128x256xf32>
    %cst_20 = arith.constant dense<0.000000e+00> : vector<8x256xf32>
    %23 = tpu.matmul %21, %22, %cst_20 {dimension_numbers = #tpu.dot_dimension_numbers<[1], [0], [0], [1], [0, 0, 1, 1], [], []>} : vector<8x128xf32>, vector<128x256xf32>, vector<8x256xf32> -> vector<8x256xf32>
    %c0_21 = arith.constant 0 : index
    %c0_22 = arith.constant 0 : index
    %24 = vector.load %arg9[%c0_21, %c0_22] : memref<1x256xf32, #tpu.memory_space<vmem>>, vector<1x256xf32>
    %25 = vector.broadcast %24 : vector<1x256xf32> to vector<8x256xf32>
    %26 = arith.addf %23, %25 : vector<8x256xf32>
    %cst_23 = arith.constant 0.000000e+00 : f32
    %27 = vector.broadcast %cst_23 : f32 to vector<8x256xf32>
    %28 = arith.maximumf %26, %27 : vector<8x256xf32>
    %c0_24 = arith.constant 0 : index
    %c0_25 = arith.constant 0 : index
    %29 = vector.load %arg10[%c0_24, %c0_25] : memref<8x256xf32, #tpu.memory_space<vmem>>, vector<8x256xf32>
    tpu.vector_store %arg10[%c0_24, %c0_25], %28 {strides = array<i32>} : memref<8x256xf32, #tpu.memory_space<vmem>>, vector<8x256xf32>,
    return
  }
  func.func @transform_0(%arg0: i32) -> (i32, i32) {
    %c0_i32 = arith.constant 0 : i32
    %c0_i32_0 = arith.constant 0 : i32
    return %arg0, %c0_i32 : i32, i32
  }
  func.func @transform_1(%arg0: i32) -> (i32, i32) {
    %c0_i32 = arith.constant 0 : i32
    %c0_i32_0 = arith.constant 0 : i32
    %c0_i32_1 = arith.constant 0 : i32
    return %c0_i32, %c0_i32_0 : i32, i32
  }
  func.func @transform_2(%arg0: i32) -> (i32, i32) {
    %c0_i32 = arith.constant 0 : i32
    %c0_i32_0 = arith.constant 0 : i32
    %c0_i32_1 = arith.constant 0 : i32
    return %c0_i32, %c0_i32_0 : i32, i32
  }
  func.func @transform_3(%arg0: i32) -> (i32, i32) {
    %c0_i32 = arith.constant 0 : i32
    %c0_i32_0 = arith.constant 0 : i32
    %c0_i32_1 = arith.constant 0 : i32
    return %c0_i32, %c0_i32_0 : i32, i32
  }
  func.func @transform_4(%arg0: i32) -> (i32, i32) {
    %c0_i32 = arith.constant 0 : i32
    %c0_i32_0 = arith.constant 0 : i32
    %c0_i32_1 = arith.constant 0 : i32
    return %c0_i32, %c0_i32_0 : i32, i32
  }
  func.func @transform_5(%arg0: i32) -> (i32, i32) {
    %c0_i32 = arith.constant 0 : i32
    %c0_i32_0 = arith.constant 0 : i32
    %c0_i32_1 = arith.constant 0 : i32
    return %c0_i32, %c0_i32_0 : i32, i32
  }
  func.func @transform_6(%arg0: i32) -> (i32, i32) {
    %c0_i32 = arith.constant 0 : i32
    %c0_i32_0 = arith.constant 0 : i32
    %c0_i32_1 = arith.constant 0 : i32
    return %c0_i32, %c0_i32_0 : i32, i32
  }
  func.func @transform_7(%arg0: i32) -> (i32, i32) {
    %c0_i32 = arith.constant 0 : i32
    %c0_i32_0 = arith.constant 0 : i32
    %c0_i32_1 = arith.constant 0 : i32
    return %c0_i32, %c0_i32_0 : i32, i32
  }
  func.func @transform_8(%arg0: i32) -> (i32, i32) {
    %c0_i32 = arith.constant 0 : i32
    %c0_i32_0 = arith.constant 0 : i32
    %c0_i32_1 = arith.constant 0 : i32
    return %c0_i32, %c0_i32_0 : i32, i32
  }
  func.func @transform_9(%arg0: i32) -> (i32, i32) {
    %c0_i32 = arith.constant 0 : i32
    %c0_i32_0 = arith.constant 0 : i32
    return %arg0, %c0_i32 : i32, i32
  }
}

</mosaic_0001>

<bundles_post_ra>
// kernel: ae_forward.1
= control target key start
LH: loop header
LB: loop body
LE: loop exit
PB: predicated region body
PF: predicated region fallthrough
CT: control target
= control target key end

     0   :  { %14 = vsyncpa [#allocation3], 0  ;;  %s717_s0 = inlined_call_operand.hbm [shape: f32[8,256], index: 0, kind: input, shape index: {}]   ;;  %s718_s1 = inlined_call_operand.hbm [shape: f32[256,128], index: 1, kind: input, shape index: {}]   ;;  %s719_s2 = inlined_call_operand.hbm [shape: f32[1,128], index: 2, kind: input, shape index: {}]   ;;  %s720_s3 = inlined_call_operand.hbm [shape: f32[128,128], index: 3, kind: input, shape index: {}]   ;;  %s721_s4 = inlined_call_operand.vmem [shape: f32[1,128], index: 4, kind: input, shape index: {}]   ;;  %s722_s5 = inlined_call_operand.hbm [shape: f32[128,128], index: 5, kind: input, shape index: {}]   ;;  %s723_s6 = inlined_call_operand.hbm [shape: f32[1,128], index: 6, kind: input, shape index: {}]   ;;  %s724_s7 = inlined_call_operand.hbm [shape: f32[128,256], index: 7, kind: input, shape index: {}]   ;;  %s725_s8 = inlined_call_operand.vmem [shape: f32[1,256], index: 8, kind: input, shape index: {}]   ;;  %s726_s9 = inlined_call_operand.hbm [shape: f32[8,256], index: 9, kind: output, shape index: {}]  }
   0x1   :  { %15 = vsyncpa [#allocation6], 0 }
   0x2   :  { %16 = vsyncpa [#allocation9], 0 }
   0x3   :  { %17 = vsyncpa [#allocation12], 0  ;;  %s34_s11 = sshll.u32 %s718_s1, 4  ;;  %s35_s11 = int_to_ptr.hbm [resolvable:$true] %s34_s11 }
   0x4   :  { %18 = vsyncpa [#allocation4], 0  ;;  %s616_s12 = smov [#allocation5]   ;;  %s58_s16 = sshll.u32 %s720_s3, 4  ;;  %s59_s16 = int_to_ptr.hbm [resolvable:$true] %s58_s16 }
   0x5   :  { %s36_s13 = sshll.u32 %s616_s12, 4  ;;  %s617_s17 = smov 128   ;;  %s37_s13 = int_to_ptr.vmem [resolvable:$true] %s36_s13 }
   0x6   :  { %s618_s18 = smov 8   ;;  %s619_s19 = smov [#allocation8]  }
   0x7   :  { %42 = dma.hbm_to_vmem [thread:$0]  %s35_s11, 4096, %s37_s13, [#allocation6], %s617_s17, %s617_s17, %s618_s18  }
   0x8   :  { %s60_s20 = sshll.u32 %s619_s19, 4  ;;  %s87_s22 = sshll.u32 %s723_s6, 4  ;;  %s61_s20 = int_to_ptr.vmem [resolvable:$true] %s60_s20  ;;  %s88_s22 = int_to_ptr.hbm [resolvable:$true] %s87_s22 }
   0x9   :  { %66 = dma.hbm_to_vmem [thread:$0]  %s59_s16, 2048, %s61_s20, [#allocation9], %s617_s17, %s617_s17, %s618_s18  }
   0xa   :  { %s24_s24 = sshll.u32 %s717_s0, 4  ;;  %s620_s25 = smov [#allocation11]   ;;  %s25_s24 = int_to_ptr.hbm [resolvable:$true] %s24_s24 }
   0xb   :  { %s89_s26 = sshll.u32 %s620_s25, 4  ;;  %s621_s27 = smov [#allocation2]   ;;  %s90_s26 = int_to_ptr.vmem [resolvable:$true] %s89_s26 }
   0xc   :  { %92 = dma.hbm_to_vmem [thread:$0]  %s88_s22, 16, %s90_s26, [#allocation12]  }
   0xd   :  { %s26_s28 = sshll.u32 %s621_s27, 4  ;;  %s48_s6 = sshll.u32 %s719_s2, 4  ;;  %s27_s28 = int_to_ptr.vmem [resolvable:$true] %s26_s28  ;;  %s49_s6 = int_to_ptr.hbm [resolvable:$true] %s48_s6 }
   0xe   :  { %29 = dma.hbm_to_vmem [thread:$0]  %s25_s24, 256, %s27_s28, [#allocation3]  }
   0xf   :  { %s73_s12 = sshll.u32 %s722_s5, 4  ;;  %s622_s13 = smov [#allocation7]   ;;  %s74_s12 = int_to_ptr.hbm [resolvable:$true] %s73_s12 }
  0x10   :  { %s50_s0 = sshll.u32 %s622_s13, 4  ;;  %s623_s14 = smov [#allocation10]   ;;  %s51_s0 = int_to_ptr.vmem [resolvable:$true] %s50_s0 }
  0x11   :  { %53 = dma.hbm_to_vmem [thread:$0]  %s49_s6, 16, %s51_s0, [#allocation6]  }
  0x12   :  { %s75_s15 = sshll.u32 %s623_s14, 4  ;;  %s97_s20 = sshll.u32 %s724_s7, 4  ;;  %s76_s15 = int_to_ptr.vmem [resolvable:$true] %s75_s15  ;;  %s98_s20 = int_to_ptr.hbm [resolvable:$true] %s97_s20 }
  0x13   :  { %81 = dma.hbm_to_vmem [thread:$0]  %s74_s12, 2048, %s76_s15, [#allocation9], %s617_s17, %s617_s17, %s618_s18  }
  0x14   :  { %s624_s2 = smov [#allocation13]   ;;  %s625_s5 = smov 256  }
  0x15   :  { %s99_s21 = sshll.u32 %s624_s2, 4  ;;  %s626_s1 = smov 16   ;;  %s100_s21 = int_to_ptr.vmem [resolvable:$true] %s99_s21 }
  0x16   :  { %105 = dma.hbm_to_vmem [thread:$0]  %s98_s20, 4096, %s100_s21, [#allocation12], %s625_s5, %s625_s5, %s626_s1  }
  0x17   :  { %606 = dma.done.wait [#allocation3], 256  }
  0x18   :  { %607 = vsyncadd [#allocation3], 4294967040 }
  0x19   :  { %608 = dma.done.wait [#allocation6], 4112  }
  0x1a   :  { %609 = vsyncadd [#allocation6], 4294963184 }
  0x1b   :  { %610 = dma.done.wait [#allocation9], 4096  }
  0x1c   :  { %611 = vsyncadd [#allocation9], 4294963200 }
  0x1d   :  { %612 = dma.done.wait [#allocation12], 4112  }
  0x1e   :  { %613 = vsyncadd [#allocation12], 4294963184  ;;  %v153_v0 = vld [vmem:[#allocation5 + $0x78] sm:$0xff]  ;;  %v152_v1 = vld [vmem:[#allocation5 + $0x70] sm:$0xff]  ;;  %s627_s22 = smov [#allocation14]   ;;  %s386_s25 = sshll.u32 %s726_s9, 4  ;;  %s387_s25 = int_to_ptr.hbm [resolvable:$true] %s386_s25 }
  0x1f   :  { %v169_v2 = vld [vmem:[#allocation5 + $0xf8] sm:$0xff]  ;;  %174 = vmatpush.msra.mxu0 %v153_v0  ;;  %v168_v3 = vld [vmem:[#allocation5 + $0xf0] sm:$0xff]  ;;  %v151_v4 = vld [vmem:[#allocation5 + $0x68] sm:$0xff]  ;;  %s384_s3 = sshll.u32 %s627_s22, 4  ;;  %s385_s3 = int_to_ptr.vmem [resolvable:$true] %s384_s3 }
  0x20   :  { %194 = vmatpush.msra.mxu1 %v169_v2  ;;  %v167_v5 = vld [vmem:[#allocation5 + $0xe8] sm:$0xff]  ;;  %v150_v6 = vld [vmem:[#allocation5 + $0x60] sm:$0xff]  ;;  %v149_v8 = vld [vmem:[#allocation5 + $0x58] sm:$0xff] }
  0x21   :  { %175 = vmatpush.msra.mxu0 %v152_v1  ;;  %v166_v7 = vld [vmem:[#allocation5 + $0xe0] sm:$0xff]  ;;  %v165_v9 = vld [vmem:[#allocation5 + $0xd8] sm:$0xff]  ;;  %v148_v10 = vld [vmem:[#allocation5 + $0x50] sm:$0xff] }
  0x22   :  { %195 = vmatpush.msra.mxu1 %v168_v3  ;;  %v164_v11 = vld [vmem:[#allocation5 + $0xd0] sm:$0xff]  ;;  %v147_v12 = vld [vmem:[#allocation5 + $0x48] sm:$0xff]  ;;  %v230_v14 = vld [vmem:[#allocation8 + $0x78] sm:$0xff] }
  0x23   :  { %176 = vmatpush.msra.mxu0 %v151_v4  ;;  %v163_v13 = vld [vmem:[#allocation5 + $0xc8] sm:$0xff]  ;;  %v229_v15 = vld [vmem:[#allocation8 + $0x70] sm:$0xff]  ;;  %v146_v16 = vld [vmem:[#allocation5 + $0x40] sm:$0xff]  ;;  %235 = vmatpush.msra.mxu2 %v230_v14 }
  0x24   :  { %196 = vmatpush.msra.mxu1 %v167_v5  ;;  %v162_v17 = vld [vmem:[#allocation5 + $0xc0] sm:$0xff]  ;;  %v228_v18 = vld [vmem:[#allocation8 + $0x68] sm:$0xff]  ;;  %v145_v19 = vld [vmem:[#allocation5 + $0x38] sm:$0xff] }
  0x25   :  { %177 = vmatpush.msra.mxu0 %v150_v6  ;;  %v161_v20 = vld [vmem:[#allocation5 + $0xb8] sm:$0xff]  ;;  %236 = vmatpush.msra.mxu2 %v229_v15  ;;  %v144_v21 = vld [vmem:[#allocation5 + $0x30] sm:$0xff]  ;;  %v227_v22 = vld [vmem:[#allocation8 + $0x60] sm:$0xff] }
  0x26   :  { %197 = vmatpush.msra.mxu1 %v166_v7  ;;  %v160_v23 = vld [vmem:[#allocation5 + $0xb0] sm:$0xff]  ;;  %v226_v24 = vld [vmem:[#allocation8 + $0x58] sm:$0xff]  ;;  %v143_v25 = vld [vmem:[#allocation5 + $0x28] sm:$0xff] }
  0x27   :  { %178 = vmatpush.msra.mxu0 %v149_v8  ;;  %237 = vmatpush.msra.mxu2 %v228_v18  ;;  %v159_v26 = vld [vmem:[#allocation5 + $0xa8] sm:$0xff]  ;;  %v225_v27 = vld [vmem:[#allocation8 + $0x50] sm:$0xff]  ;;  %v142_v28 = vld [vmem:[#allocation5 + $0x20] sm:$0xff] }
  0x28   :  { %198 = vmatpush.msra.mxu1 %v165_v9  ;;  %v158_v29 = vld [vmem:[#allocation5 + $0xa0] sm:$0xff]  ;;  %v224_v30 = vld [vmem:[#allocation8 + $0x48] sm:$0xff]  ;;  %v141_v31 = vld [vmem:[#allocation5 + $0x18] sm:$0xff] }
  0x29   :  { %179 = vmatpush.msra.mxu0 %v148_v10  ;;  %238 = vmatpush.msra.mxu2 %v227_v22  ;;  %v157_v32 = vld [vmem:[#allocation5 + $0x98] sm:$0xff]  ;;  %v223_v33 = vld [vmem:[#allocation8 + $0x40] sm:$0xff]  ;;  %v140_v34 = vld [vmem:[#allocation5 + $0x10] sm:$0xff] }
  0x2a   :  { %199 = vmatpush.msra.mxu1 %v164_v11  ;;  %v156_v35 = vld [vmem:[#allocation5 + $0x90] sm:$0xff]  ;;  %v222_v36 = vld [vmem:[#allocation8 + $0x38] sm:$0xff]  ;;  %v139_v37 = vld [vmem:[#allocation5 + $0x8] sm:$0xff] }
  0x2b   :  { %180 = vmatpush.msra.mxu0 %v147_v12  ;;  %239 = vmatpush.msra.mxu2 %v226_v24  ;;  %v155_v38 = vld [vmem:[#allocation5 + $0x88] sm:$0xff]  ;;  %v221_v39 = vld [vmem:[#allocation8 + $0x30] sm:$0xff]  ;;  %v138_v40 = vld [vmem:[#allocation5] sm:$0xff] }
  0x2c   :  { %200 = vmatpush.msra.mxu1 %v163_v13  ;;  %v154_v41 = vld [vmem:[#allocation5 + $0x80] sm:$0xff]  ;;  %v136_v42 = vld [vmem:[#allocation2] sm:$0xff]  ;;  %v137_v43 = vld [vmem:[#allocation2 + $0x8] sm:$0xff] }
  0x2d   :  { %181 = vmatpush.msra.mxu0 %v146_v16  ;;  %240 = vmatpush.msra.mxu2 %v225_v27  ;;  %v220_v44 = vld [vmem:[#allocation8 + $0x28] sm:$0xff]  ;;  %v219_v45 = vld [vmem:[#allocation8 + $0x20] sm:$0xff]  ;;  %v218_v46 = vld [vmem:[#allocation8 + $0x18] sm:$0xff] }
  0x2e   :  { %201 = vmatpush.msra.mxu1 %v162_v17  ;;  %v217_v47 = vld [vmem:[#allocation8 + $0x10] sm:$0xff]  ;;  %v216_v48 = vld [vmem:[#allocation8 + $0x8] sm:$0xff]  ;;  %v215_v49 = vld [vmem:[#allocation8] sm:$0xff] }
  0x2f   :  { %182 = vmatpush.msra.mxu0 %v145_v19  ;;  %241 = vmatpush.msra.mxu2 %v224_v30  ;;  %v271_v50 = vld [vmem:[#allocation10 + $0x78] sm:$0xff]  ;;  %v270_v51 = vld [vmem:[#allocation10 + $0x70] sm:$0xff]  ;;  %v269_v52 = vld [vmem:[#allocation10 + $0x68] sm:$0xff] }
  0x30   :  { %202 = vmatpush.msra.mxu1 %v161_v20  ;;  %276 = vmatpush.msra.mxu3 %v271_v50  ;;  %v268_v53 = vld [vmem:[#allocation10 + $0x60] sm:$0xff]  ;;  %v267_v54 = vld [vmem:[#allocation10 + $0x58] sm:$0xff]  ;;  %v266_v55 = vld [vmem:[#allocation10 + $0x50] sm:$0xff] }
  0x31   :  { %183 = vmatpush.msra.mxu0 %v144_v21  ;;  %242 = vmatpush.msra.mxu2 %v223_v33  ;;  %v265_v56 = vld [vmem:[#allocation10 + $0x48] sm:$0xff]  ;;  %v264_v57 = vld [vmem:[#allocation10 + $0x40] sm:$0xff]  ;;  %v263_v58 = vld [vmem:[#allocation10 + $0x38] sm:$0xff] }
  0x32   :  { %203 = vmatpush.msra.mxu1 %v160_v23  ;;  %277 = vmatpush.msra.mxu3 %v270_v51  ;;  %v262_v59 = vld [vmem:[#allocation10 + $0x30] sm:$0xff]  ;;  %v261_v60 = vld [vmem:[#allocation10 + $0x28] sm:$0xff]  ;;  %v260_v61 = vld [vmem:[#allocation10 + $0x20] sm:$0xff] }
  0x33   :  { %184 = vmatpush.msra.mxu0 %v143_v25  ;;  %243 = vmatpush.msra.mxu2 %v222_v36  ;;  %v411_v62 = vld [vmem:[#allocation7] ss:$0 sm:$0xff]  ;;  %v258_v5 = vld [vmem:[#allocation10 + $0x10] sm:$0xff]  ;;  %v257_v6 = vld [vmem:[#allocation10 + $0x8] sm:$0xff] }
  0x34   :  { %204 = vmatpush.msra.mxu1 %v159_v26  ;;  %278 = vmatpush.msra.mxu3 %v269_v52  ;;  %v259_v63 = vld [vmem:[#allocation10 + $0x18] sm:$0xff]  ;;  %v256_v7 = vld [vmem:[#allocation10] sm:$0xff]  ;;  %v326_v11 = vld [vmem:[#allocation13 + $0xe8] sm:$0xff] }
  0x35   :  { %185 = vmatpush.msra.mxu0 %v142_v28  ;;  %244 = vmatpush.msra.mxu2 %v221_v39  ;;  %v327_v8 = vld [vmem:[#allocation13 + $0xf0] sm:$0xff]  ;;  %v328_v9 = vld [vmem:[#allocation13 + $0xf8] sm:$0xff]  ;;  %v325_v10 = vld [vmem:[#allocation13 + $0xe0] sm:$0xff] }
  0x36   :  { %205 = vmatpush.msra.mxu1 %v158_v29  ;;  %279 = vmatpush.msra.mxu3 %v268_v53  ;;  %v323_v12 = vld [vmem:[#allocation13 + $0xd0] sm:$0xff]  ;;  %v324_v13 = vld [vmem:[#allocation13 + $0xd8] sm:$0xff]  ;;  %v321_v14 = vld [vmem:[#allocation13 + $0xc0] sm:$0xff] }
  0x37   :  { %186 = vmatpush.msra.mxu0 %v141_v31  ;;  %245 = vmatpush.msra.mxu2 %v220_v44  ;;  %v322_v15 = vld [vmem:[#allocation13 + $0xc8] sm:$0xff]  ;;  %v319_v16 = vld [vmem:[#allocation13 + $0xb0] sm:$0xff]  ;;  %v320_v17 = vld [vmem:[#allocation13 + $0xb8] sm:$0xff] }
  0x38   :  { %206 = vmatpush.msra.mxu1 %v157_v32  ;;  %280 = vmatpush.msra.mxu3 %v267_v54  ;;  %v317_v18 = vld [vmem:[#allocation13 + $0xa0] sm:$0xff]  ;;  %v318_v19 = vld [vmem:[#allocation13 + $0xa8] sm:$0xff]  ;;  %v315_v20 = vld [vmem:[#allocation13 + $0x90] sm:$0xff] }
  0x39   :  { %187 = vmatpush.msra.mxu0 %v140_v34  ;;  %246 = vmatpush.msra.mxu2 %v219_v45  ;;  %v316_v21 = vld [vmem:[#allocation13 + $0x98] sm:$0xff]  ;;  %v313_v22 = vld [vmem:[#allocation13 + $0x80] sm:$0xff]  ;;  %v314_v23 = vld [vmem:[#allocation13 + $0x88] sm:$0xff] }
  0x3a   :  { %207 = vmatpush.msra.mxu1 %v156_v35  ;;  %281 = vmatpush.msra.mxu3 %v266_v55  ;;  %v311_v24 = vld [vmem:[#allocation13 + $0x70] sm:$0xff]  ;;  %v312_v25 = vld [vmem:[#allocation13 + $0x78] sm:$0xff]  ;;  %v309_v26 = vld [vmem:[#allocation13 + $0x60] sm:$0xff] }
  0x3b   :  { %188 = vmatpush.msra.mxu0 %v139_v37  ;;  %247 = vmatpush.msra.mxu2 %v218_v46  ;;  %v310_v27 = vld [vmem:[#allocation13 + $0x68] sm:$0xff]  ;;  %v307_v28 = vld [vmem:[#allocation13 + $0x50] sm:$0xff]  ;;  %v308_v29 = vld [vmem:[#allocation13 + $0x58] sm:$0xff] }
  0x3c   :  { %208 = vmatpush.msra.mxu1 %v155_v38  ;;  %282 = vmatpush.msra.mxu3 %v265_v56  ;;  %v305_v30 = vld [vmem:[#allocation13 + $0x40] sm:$0xff]  ;;  %v306_v31 = vld [vmem:[#allocation13 + $0x48] sm:$0xff]  ;;  %v303_v32 = vld [vmem:[#allocation13 + $0x30] sm:$0xff] }
  0x3d   :  { %189 = vmatpush.msra.mxu0 %v138_v40  ;;  %248 = vmatpush.msra.mxu2 %v217_v47  ;;  %v304_v33 = vld [vmem:[#allocation13 + $0x38] sm:$0xff]  ;;  %v412_v34 = vld [vmem:[%s721_s4] ss:$0 sm:$0xff]  ;;  %v301_v38 = vld [vmem:[#allocation13 + $0x20] sm:$0xff] }
  0x3e   :  { %209 = vmatpush.msra.mxu1 %v154_v41  ;;  %190 = vmatmul.f32.vlgmr.msra.gmra.mxu0 %v136_v42  ;;  %v302_v39 = vld [vmem:[#allocation13 + $0x28] sm:$0xff]  ;;  %v299_v40 = vld [vmem:[#allocation13 + $0x10] sm:$0xff]  ;;  %v300_v41 = vld [vmem:[#allocation13 + $0x18] sm:$0xff] }
  0x3f   :  { %210 = vmatmul.f32.vlgmr.msra.gmra.mxu1 %v137_v43  ;;  %249 = vmatpush.msra.mxu2 %v216_v48  ;;  %v297_v42 = vld [vmem:[#allocation13] sm:$0xff]  ;;  %v298_v43 = vld [vmem:[#allocation13 + $0x8] sm:$0xff]  ;;  %v413_v44 = vld [vmem:[#allocation11] ss:$0 sm:$0xff] }
  0x40   :  { %283 = vmatpush.msra.mxu3 %v264_v57  ;;  %335 = vmatpush.msrb.mxu0 %v327_v8  ;;  %v329_v48 = vld [vmem:[%s725_s8] sm:$0x3] }
  0x41   :  { %250 = vmatpush.msra.mxu2 %v215_v49  ;;  %355 = vmatpush.msrb.mxu1 %v328_v9  ;;  %v331_v49 = vperm.slane %v329_v48, 0  ;;  %v332_v50 = vperm.slane %v329_v48, 1 }
  0x42   :  { %284 = vmatpush.msra.mxu3 %v263_v58  ;;  %336 = vmatpush.msrb.mxu0 %v325_v10 }
  0x43   :  { %356 = vmatpush.msrb.mxu1 %v326_v11 }
  0x44   :  { %285 = vmatpush.msra.mxu3 %v262_v59  ;;  %337 = vmatpush.msrb.mxu0 %v323_v12 }
  0x45   :  { %357 = vmatpush.msrb.mxu1 %v324_v13 }
  0x46   :  { %286 = vmatpush.msra.mxu3 %v261_v60  ;;  %338 = vmatpush.msrb.mxu0 %v321_v14 }
  0x47   :  { %358 = vmatpush.msrb.mxu1 %v322_v15 }
  0x48   :  { %287 = vmatpush.msra.mxu3 %v260_v61  ;;  %339 = vmatpush.msrb.mxu0 %v319_v16 }
  0x49   :  { %359 = vmatpush.msrb.mxu1 %v320_v17 }
  0x4a   :  { %288 = vmatpush.msra.mxu3 %v259_v63  ;;  %340 = vmatpush.msrb.mxu0 %v317_v18 }
  0x4b   :  { %360 = vmatpush.msrb.mxu1 %v318_v19 }
  0x4c   :  { %289 = vmatpush.msra.mxu3 %v258_v5  ;;  %341 = vmatpush.msrb.mxu0 %v315_v20 }
  0x4d   :  { %361 = vmatpush.msrb.mxu1 %v316_v21 }
  0x4e   :  { %290 = vmatpush.msra.mxu3 %v257_v6  ;;  %342 = vmatpush.msrb.mxu0 %v313_v22 }
  0x4f   :  { %362 = vmatpush.msrb.mxu1 %v314_v23 }
  0x50   :  { %291 = vmatpush.msra.mxu3 %v256_v7  ;;  %343 = vmatpush.msrb.mxu0 %v311_v24 }
  0x51   :  { %363 = vmatpush.msrb.mxu1 %v312_v25 }
  0x52   :  { %344 = vmatpush.msrb.mxu0 %v309_v26 }
  0x53   :  { %364 = vmatpush.msrb.mxu1 %v310_v27 }
  0x54   :  { %345 = vmatpush.msrb.mxu0 %v307_v28 }
  0x55   :  { %365 = vmatpush.msrb.mxu1 %v308_v29 }
  0x56   :  { %346 = vmatpush.msrb.mxu0 %v305_v30 }
  0x57   :  { %366 = vmatpush.msrb.mxu1 %v306_v31 }
  0x58   :  { %347 = vmatpush.msrb.mxu0 %v303_v32 }
  0x59   :  { %367 = vmatpush.msrb.mxu1 %v304_v33 }
  0x5a   :  { %348 = vmatpush.msrb.mxu0 %v301_v38 }
  0x5b   :  { %368 = vmatpush.msrb.mxu1 %v302_v39 }
  0x5c   :  { %349 = vmatpush.msrb.mxu0 %v299_v40 }
  0x5d   :  { %369 = vmatpush.msrb.mxu1 %v300_v41 }
  0x5e   :  { %350 = vmatpush.msrb.mxu0 %v297_v42 }
  0x5f   :  { %370 = vmatpush.msrb.mxu1 %v298_v43 }
  0xbb   :  { %v191_v0 = vpop.f32.mrf.mxu0 }
  0xbc   :  { %v211_v1 = vpop.f32.mrf.mxu1  ;;  %v192_v2 = vadd.f32 %v411_v62, %v191_v0 }
  0xbe   :  { %v212_v3 = vadd.f32 %v211_v1, %v192_v2 }
  0xc0   :  { %v214_v4 = vmax.f32 %v212_v3, 0.0 }
  0xc2   :  { %251 = vmatmul.f32.vlgmr.msra.gmra.mxu2 %v214_v4 }
 0x145   :  { %v252_v35 = vpop.f32.mrf.mxu2 }
 0x146   :  { %v253_v36 = vadd.f32 %v412_v34, %v252_v35 }
 0x148   :  { %v255_v37 = vmax.f32 %v253_v36, 0.0 }
 0x14a   :  { %292 = vmatmul.f32.vlgmr.msra.gmra.mxu3 %v255_v37 }
 0x1cd   :  { %v293_v45 = vpop.f32.mrf.mxu3 }
 0x1ce   :  { %v294_v46 = vadd.f32 %v413_v44, %v293_v45 }
 0x1d0   :  { %v296_v47 = vmax.f32 %v294_v46, 0.0 }
 0x1d2   :  { %351 = vmatmul.f32.vlgmr.msrb.gmra.mxu0 %v296_v47  ;;  %371 = vmatmul.f32.vlgmr.msrb.gmra.mxu1 %v296_v47 }
 0x24f   :  { %v352_v51 = vpop.f32.mrf.mxu0  ;;  %v372_v52 = vpop.f32.mrf.mxu1 }
 0x250   :  { %v353_v53 = vadd.f32 %v352_v51, %v331_v49  ;;  %v373_v54 = vadd.f32 %v372_v52, %v332_v50 }
 0x252   :  { %v375_v55 = vmax.f32 %v353_v53, 0.0  ;;  %v376_v56 = vmax.f32 %v373_v54, 0.0 }
 0x254   :  { %377 = vst [vmem:[#allocation14] sm:$0xff] %v375_v55 }
 0x255   :  { %378 = vst [vmem:[#allocation14 + $0x8] sm:$0xff] %v376_v56 }
 0x256   :  { %389 = dma.vmem_to_hbm [thread:$0]  %s385_s3, 256, %s387_s25, [#allocation4]  }
 0x257   :  { %614 = dma.done.wait [#allocation4], 256  }
 0x258   :  { %615 = vsyncadd [#allocation4], 4294967040 }
 0x259   :  { %394 = vsyncpa [#allocation3], 1 }
 0x25a   :  { %395 = vsyncpa [#allocation6], 1 }
 0x25b   :  { %396 = vsyncpa [#allocation9], 1 }
 0x25c   :  { %397 = vsyncpa [#allocation12], 1 }
 0x25d   :  { %398 = vsyncpa [#allocation4], 1 }

</bundles_post_ra>
